<compile_context>
chip_gen: v7x
topology: tpu7x:2x2x1
jax: 0.10.0
libtpu: 0.0.40
codegen_flags: <defaults>
</compile_context>

<pallas_src>
import functools

import jax
import jax.numpy as jnp
from jax.experimental import pallas as pl
from jax.experimental.pallas import tpu as pltpu

_LANES = 128
_SUBLANES = 8


def _round_up(n, m):
    return ((n + m - 1) // m) * m


def _choose_batch_tile(B, batch_tile):
    if B <= _LANES:
        return B  # single small tile (block lane dim == full batch extent)
    tb = min(batch_tile, _round_up(B, _LANES))
    # Guarantee >= 2 grid steps so the "parallel" batch axis can be split
    # across both v7x TensorCores (harmless extra step on v5e/v6e).
    half = max(_LANES, _round_up((B + 1) // 2, _LANES))
    return min(tb, half)


def policy_net_kernel(x_ref, w1_ref, b1_ref, w2_ref, b2_ref, out_ref):
    """One batch tile, batch-on-lanes layout.

    x:   [S, tb]                (batch on the 128-lane axis)
    w1:  [H, S]    b1: [H, 1]   (PyTorch [out, in] layout, VMEM-resident)
    w2:  [A8, H]   b2: [A8, 1]  (action axis zero-padded up to 8 sublanes)
    out: [A, tb]                (un-padded action axis)
    """
    a = out_ref.shape[0]

    x = x_ref[...]

    # fc1 + ReLU (f32 accumulation on the MXU).
    h = jnp.dot(w1_ref[...], x, preferred_element_type=jnp.float32) + b1_ref[...]
    h = jnp.maximum(h, 0.0).astype(w2_ref.dtype)

    # fc2.  The padded action rows are all-zero weights/bias; drop them before
    # the softmax so they cannot touch the denominator.
    logits = jnp.dot(w2_ref[...], h, preferred_element_type=jnp.float32) + b2_ref[...]
    logits = logits[:a, :]

    # Numerically stable softmax along the action (sublane) axis.
    m = jnp.max(logits, axis=0, keepdims=True)        # [1, tb]
    e = jnp.exp(logits - m)                            # [A, tb]
    denom = jnp.sum(e, axis=0, keepdims=True)          # [1, tb]
    out_ref[...] = (e * (1.0 / denom)).astype(out_ref.dtype)  # exact divide


def prepare_policy_params(w1, b1, w2, b2, dtype=jnp.float32):
    """One-time layout prep (do NOT call per forward).

    Inputs are PyTorch-layout: w1 [H, S], b1 [H], w2 [A, H], b2 [A].
    The batch-on-lanes kernel wants exactly the PyTorch [out, in] weight
    layout; biases become column vectors; fc2's action axis is zero-padded up
    to 8 rows (dropped again inside the kernel).

    `dtype=jnp.bfloat16` is an optional v6e/v7x saving (halves x/weight
    HBM+VMEM traffic; accumulation and softmax stay f32).  Keep f32 on v5e.
    """
    H, S = w1.shape
    A = w2.shape[0]
    a8 = _round_up(A, _SUBLANES)

    w1 = jnp.asarray(w1, dtype).reshape(H, S)
    b1 = jnp.asarray(b1, jnp.float32).reshape(H, 1)
    w2 = jnp.asarray(w2, dtype).reshape(A, H)
    b2 = jnp.asarray(b2, jnp.float32).reshape(A, 1)
    if a8 != A:
        w2 = jnp.pad(w2, ((0, a8 - A), (0, 0)))
        b2 = jnp.pad(b2, ((0, a8 - A), (0, 0)))
    return (w1, b1, w2, b2), A


@functools.partial(
    jax.jit, static_argnames=("action_dim", "batch_tile", "force_pallas"))
def policy_net_forward(x, params, *, action_dim, batch_tile=4096,
                       force_pallas=False):
    """x: [B, state_dim].  Returns softmax probabilities [B, action_dim]."""
    w1, b1, w2, b2 = params
    B, S = x.shape
    H = w1.shape[0]
    A8 = w2.shape[0]
    x = x.astype(w1.dtype)

    # For tiny batches a pallas_call is pure fixed cost (launch + DMA
    # descriptors for <1 KB of data); let XLA fuse it instead.
    if not force_pallas and B < 256:
        h = jnp.maximum(x @ w1.T + b1[:, 0], 0.0)
        logits = (h @ w2[:action_dim].T + b2[:action_dim, 0]).astype(jnp.float32)
        return jax.nn.softmax(logits, axis=1)

    tb = _choose_batch_tile(B, batch_tile)
    grid = (pl.cdiv(B, tb),)

    # One cheap transpose so batch lands on the lane axis (16 B/sample).
    xt = x.T  # [S, B]

    probs_t = pl.pallas_call(
        policy_net_kernel,
        out_shape=jax.ShapeDtypeStruct((action_dim, B), jnp.float32),
        grid_spec=pltpu.PrefetchScalarGridSpec(
            num_scalar_prefetch=0,
            grid=grid,
            in_specs=[
                pl.BlockSpec((S, tb), lambda i: (0, i)),   # x: tiled on batch
                pl.BlockSpec((H, S), lambda i: (0, 0)),    # weights stay resident
                pl.BlockSpec((H, 1), lambda i: (0, 0)),
                pl.BlockSpec((A8, H), lambda i: (0, 0)),
                pl.BlockSpec((A8, 1), lambda i: (0, 0)),
            ],
            out_specs=pl.BlockSpec((action_dim, tb), lambda i: (0, i)),
        ),
        compiler_params=pltpu.CompilerParams(
            dimension_semantics=("parallel",),
        ),
    )(xt, w1, b1, w2, b2)

    # Tiny (action_dim, B) -> (B, action_dim) transpose.
    return probs_t.T


def init_linear_params(key, in_features, out_features):
    """Deterministic init mimicking torch.nn.Linear default U(-1/sqrt(fan_in), +)."""
    kw, kb = jax.random.split(key)
    bound = 1.0 / jnp.sqrt(jnp.float32(in_features))
    w = jax.random.uniform(kw, (out_features, in_features), jnp.float32, -bound, bound)
    b = jax.random.uniform(kb, (out_features,), jnp.float32, -bound, bound)
    return w, b


if __name__ == "__main__":
    # Shapes from the module: state_dim=4 (CartPole-like), hidden_dim=128, action_dim=2.
    batch = 8
    state_dim = 4
    hidden_dim = 128
    action_dim = 2

    key = jax.random.PRNGKey(0)
    k_x, k_x2, k_fc1, k_fc2 = jax.random.split(key, 4)

    x_small = jax.random.normal(k_x, (batch, state_dim), jnp.float32)
    w1, b1 = init_linear_params(k_fc1, state_dim, hidden_dim)
    w2, b2 = init_linear_params(k_fc2, hidden_dim, action_dim)

    # One-time layout prep (hoisted out of the per-call path).
    params, a_dim = prepare_policy_params(w1, b1, w2, b2)

    def reference(xs):
        h_ref = jnp.maximum(xs @ w1.T + b1, 0.0)
        return jax.nn.softmax(h_ref @ w2.T + b2, axis=1)

    # 1) Small demo batch, forced through the Pallas kernel.
    probs = jax.block_until_ready(
        policy_net_forward(x_small, params, action_dim=a_dim, force_pallas=True))
    assert probs.shape == (batch, action_dim)
    assert jnp.allclose(probs, reference(x_small), atol=1e-3, rtol=1e-3), (
        jnp.max(jnp.abs(probs - reference(x_small))))
    assert jnp.allclose(jnp.sum(probs, axis=1), 1.0, atol=1e-4)

    # 2) TRPO-sized batch: multiple grid steps + a partial last tile.
    x_big = jax.random.normal(k_x2, (1000, state_dim), jnp.float32)
    probs_big = jax.block_until_ready(
        policy_net_forward(x_big, params, action_dim=a_dim))
    assert probs_big.shape == (1000, action_dim)
    assert jnp.allclose(probs_big, reference(x_big), atol=1e-3, rtol=1e-3), (
        jnp.max(jnp.abs(probs_big - reference(x_big))))
    assert jnp.allclose(jnp.sum(probs_big, axis=1), 1.0, atol=1e-4)

    print("KERNEL_OK")
</pallas_src>

<mosaic_0001>
module attributes {stable_mosaic.version = 11 : i64} {
  func.func @policy_net_kernel(%arg0: i32, %arg1: memref<4x8xf32, #tpu.memory_space<vmem>>, %arg2: memref<128x4xf32, #tpu.memory_space<vmem>>, %arg3: memref<128x1xf32, #tpu.memory_space<vmem>>, %arg4: memref<8x128xf32, #tpu.memory_space<vmem>>, %arg5: memref<8x1xf32, #tpu.memory_space<vmem>>, %arg6: memref<2x8xf32, #tpu.memory_space<vmem>>) attributes {dimension_semantics = [#tpu.dimension_semantics<parallel>], iteration_bounds = array<i64: 1>, scalar_prefetch = 0 : i64, scratch_operands = 0 : i64, tpu.core_type = #tpu.core_type<tc>, window_params = [{transform_indices = @transform_0, window_bounds = array<i64: 4, 8>}, {pipeline_mode = #tpu.pipeline_mode<synchronous>, transform_indices = @transform_1, window_bounds = array<i64: 128, 4>}, {pipeline_mode = #tpu.pipeline_mode<synchronous>, transform_indices = @transform_2, window_bounds = array<i64: 128, 1>}, {pipeline_mode = #tpu.pipeline_mode<synchronous>, transform_indices = @transform_3, window_bounds = array<i64: 8, 128>}, {pipeline_mode = #tpu.pipeline_mode<synchronous>, transform_indices = @transform_4, window_bounds = array<i64: 8, 1>}, {transform_indices = @transform_5, window_bounds = array<i64: 2, 8>}]} {
    %c0 = arith.constant 0 : index
    %c0_0 = arith.constant 0 : index
    %0 = vector.load %arg1[%c0, %c0_0] : memref<4x8xf32, #tpu.memory_space<vmem>>, vector<4x8xf32>
    %c0_1 = arith.constant 0 : index
    %c0_2 = arith.constant 0 : index
    %1 = vector.load %arg2[%c0_1, %c0_2] : memref<128x4xf32, #tpu.memory_space<vmem>>, vector<128x4xf32>
    %cst = arith.constant dense<0.000000e+00> : vector<128x8xf32>
    %2 = tpu.matmul %1, %0, %cst {dimension_numbers = #tpu.dot_dimension_numbers<[1], [0], [0], [1], [0, 0, 1, 1], [], []>} : vector<128x4xf32>, vector<4x8xf32>, vector<128x8xf32> -> vector<128x8xf32>
    %c0_3 = arith.constant 0 : index
    %c0_4 = arith.constant 0 : index
    %3 = vector.load %arg3[%c0_3, %c0_4] : memref<128x1xf32, #tpu.memory_space<vmem>>, vector<128x1xf32>
    %4 = vector.broadcast %3 : vector<128x1xf32> to vector<128x8xf32>
    %5 = arith.addf %2, %4 : vector<128x8xf32>
    %cst_5 = arith.constant 0.000000e+00 : f32
    %6 = vector.broadcast %cst_5 : f32 to vector<128x8xf32>
    %7 = arith.maximumf %5, %6 : vector<128x8xf32>
    %c0_6 = arith.constant 0 : index
    %c0_7 = arith.constant 0 : index
    %8 = vector.load %arg4[%c0_6, %c0_7] : memref<8x128xf32, #tpu.memory_space<vmem>>, vector<8x128xf32>
    %cst_8 = arith.constant dense<0.000000e+00> : vector<8x8xf32>
    %9 = tpu.matmul %8, %7, %cst_8 {dimension_numbers = #tpu.dot_dimension_numbers<[1], [0], [0], [1], [0, 0, 1, 1], [], []>} : vector<8x128xf32>, vector<128x8xf32>, vector<8x8xf32> -> vector<8x8xf32>
    %c0_9 = arith.constant 0 : index
    %c0_10 = arith.constant 0 : index
    %10 = vector.load %arg5[%c0_9, %c0_10] : memref<8x1xf32, #tpu.memory_space<vmem>>, vector<8x1xf32>
    %11 = vector.broadcast %10 : vector<8x1xf32> to vector<8x8xf32>
    %12 = arith.addf %9, %11 : vector<8x8xf32>
    %13 = vector.extract_strided_slice %12 {offsets = [0, 0], sizes = [2, 8], strides = [1, 1]} : vector<8x8xf32> to vector<2x8xf32>
    %cst_11 = arith.constant dense<0xFF800000> : vector<8xf32>
    %14 = vector.multi_reduction <maximumf>, %13, %cst_11 [0] : vector<2x8xf32> to vector<8xf32>
    %15 = vector.shape_cast %14 : vector<8xf32> to vector<1x8xf32>
    %16 = vector.broadcast %15 : vector<1x8xf32> to vector<2x8xf32>
    %17 = arith.subf %13, %16 : vector<2x8xf32>
    %18 = math.exp %17 : vector<2x8xf32>
    %cst_12 = arith.constant dense<0.000000e+00> : vector<8xf32>
    %19 = vector.multi_reduction <add>, %18, %cst_12 [0] : vector<2x8xf32> to vector<8xf32>
    %20 = vector.shape_cast %19 : vector<8xf32> to vector<1x8xf32>
    %cst_13 = arith.constant 1.000000e+00 : f32
    %21 = vector.broadcast %cst_13 : f32 to vector<1x8xf32>
    %22 = arith.divf %21, %20 : vector<1x8xf32>
    %23 = vector.broadcast %22 : vector<1x8xf32> to vector<2x8xf32>
    %24 = arith.mulf %18, %23 : vector<2x8xf32>
    %c0_14 = arith.constant 0 : index
    %c0_15 = arith.constant 0 : index
    %25 = vector.load %arg6[%c0_14, %c0_15] : memref<2x8xf32, #tpu.memory_space<vmem>>, vector<2x8xf32>
    tpu.vector_store %arg6[%c0_14, %c0_15], %24 {strides = array<i32>} : memref<2x8xf32, #tpu.memory_space<vmem>>, vector<2x8xf32>,
    return
  }
  func.func @transform_0(%arg0: i32) -> (i32, i32) {
    %c0_i32 = arith.constant 0 : i32
    %c0_i32_0 = arith.constant 0 : i32
    return %c0_i32, %arg0 : i32, i32
  }
  func.func @transform_1(%arg0: i32) -> (i32, i32) {
    %c0_i32 = arith.constant 0 : i32
    %c0_i32_0 = arith.constant 0 : i32
    %c0_i32_1 = arith.constant 0 : i32
    return %c0_i32, %c0_i32_0 : i32, i32
  }
  func.func @transform_2(%arg0: i32) -> (i32, i32) {
    %c0_i32 = arith.constant 0 : i32
    %c0_i32_0 = arith.constant 0 : i32
    %c0_i32_1 = arith.constant 0 : i32
    return %c0_i32, %c0_i32_0 : i32, i32
  }
  func.func @transform_3(%arg0: i32) -> (i32, i32) {
    %c0_i32 = arith.constant 0 : i32
    %c0_i32_0 = arith.constant 0 : i32
    %c0_i32_1 = arith.constant 0 : i32
    return %c0_i32, %c0_i32_0 : i32, i32
  }
  func.func @transform_4(%arg0: i32) -> (i32, i32) {
    %c0_i32 = arith.constant 0 : i32
    %c0_i32_0 = arith.constant 0 : i32
    %c0_i32_1 = arith.constant 0 : i32
    return %c0_i32, %c0_i32_0 : i32, i32
  }
  func.func @transform_5(%arg0: i32) -> (i32, i32) {
    %c0_i32 = arith.constant 0 : i32
    %c0_i32_0 = arith.constant 0 : i32
    return %c0_i32, %arg0 : i32, i32
  }
}

</mosaic_0001>

<bundles_post_ra>
// kernel: policy_net_forward.1
= control target key start
LH: loop header
LB: loop body
LE: loop exit
PB: predicated region body
PF: predicated region fallthrough
CT: control target
= control target key end

     0   :  { %vm183_vm0 = vcmask 1043456   ;;  %vm134_vm1 = vcmask 31744   ;;  %v632_v4 = vmov 0   ;;  %s811_s0 = inlined_call_operand.vmem [shape: f32[4,8], index: 0, kind: input, shape index: {}]   ;;  %s812_s1 = inlined_call_operand.vmem [shape: f32[128,4], index: 1, kind: input, shape index: {}]   ;;  %s813_s2 = inlined_call_operand.vmem [shape: f32[128,1], index: 2, kind: input, shape index: {}]   ;;  %s814_s3 = inlined_call_operand.vmem [shape: f32[8,128], index: 3, kind: input, shape index: {}]   ;;  %s815_s4 = inlined_call_operand.vmem [shape: f32[8,1], index: 4, kind: input, shape index: {}]   ;;  %s816_s5 = inlined_call_operand.hbm [shape: f32[2,8], index: 5, kind: output, shape index: {}]  }
   0x1   :  { %v21_v0 = vld [vmem:[%s811_s0] sm:$0xf]  ;;  %v23_v2 = vld [vmem:[%s812_s1 + $0x8] sm:$0xff]  ;;  %v24_v3 = vld [vmem:[%s812_s1 + $0x10] sm:$0xff]  ;;  %602 = vset.pattern.permute.xlu0 %v632_v4  ;;  %603 = vset.pattern.permute.xlu1 %v632_v4 }
   0x2   :  { %v22_v1 = vld [vmem:[%s812_s1] sm:$0xff]  ;;  %512 = vmatprep.subr.msk.mxu0 %vm183_vm0, %v21_v0  ;;  %v25_v5 = vld [vmem:[%s812_s1 + $0x18] sm:$0xff]  ;;  %v40_v8 = vld [vmem:[%s813_s2 + $0x10] sm:$0xff] }
   0x3   :  { %514 = vmatprep.mubr.msk.f32.mxu0 %vm134_vm1, %v22_v1  ;;  %513 = vmatpush3.msk.msra.mxu0 %vm183_vm0, %v21_v0  ;;  %v26_v6 = vld [vmem:[%s812_s1 + $0x20] sm:$0xff]  ;;  %v39_v9 = vld [vmem:[%s813_s2 + $0x8] sm:$0xff]  ;;  %v41_v11 = vld [vmem:[%s813_s2 + $0x18] sm:$0xff] }
   0x4   :  { %515 = vmatmul.mubr.msk.f32.vlgmr.msra.gmra.mrb[0].mxu0 %vm134_vm1, %v23_v2  ;;  %v38_v7 = vld [vmem:[%s813_s2] sm:$0xff]  ;;  %66 = vperm.xlu1 %603, %v40_v8   ;;  %v27_v10 = vld [vmem:[%s812_s1 + $0x28] sm:$0xff]  ;;  %v28_v12 = vld [vmem:[%s812_s1 + $0x30] sm:$0xff] }
   0x5   :  { %517 = vmatprep.mubr.msk.f32.mxu0 %vm134_vm1, %v24_v3  ;;  %56 = vperm.xlu0 %602, %v38_v7   ;;  %v42_v13 = vld [vmem:[%s813_s2 + $0x20] sm:$0xff] }
   0x8   :  { %518 = vmatmul.mubr.msk.f32.gmra.mrb[2].mxu0 %vm134_vm1, %v25_v5  ;;  %71 = vperm.xlu1 %603, %v41_v11  }
   0x9   :  { %520 = vmatprep.mubr.msk.f32.mxu0 %vm134_vm1, %v26_v6  ;;  %61 = vperm.xlu0 %602, %v39_v9  }
   0xc   :  { %521 = vmatmul.mubr.msk.f32.gmra.mrb[4].mxu0 %vm134_vm1, %v27_v10 }
   0xd   :  { %10 = vsyncpa [#allocation3], 0  ;;  %523 = vmatprep.mubr.msk.f32.mxu0 %vm134_vm1, %v28_v12  ;;  %v29_v14 = vld [vmem:[%s812_s1 + $0x38] sm:$0xff]  ;;  %v43_v15 = vld [vmem:[%s813_s2 + $0x28] sm:$0xff]  ;;  %76 = vperm.xlu0 %602, %v42_v13   ;;  %v633_v35 = vmov 0.0|0.0   ;;  %vm634_vm2 = vmmov 0  }
   0xe   :  { %v30_v16 = vld [vmem:[%s812_s1 + $0x40] sm:$0xff]  ;;  %v44_v17 = vld [vmem:[%s813_s2 + $0x30] sm:$0xff]  ;;  %81 = vperm.xlu1 %603, %v43_v15   ;;  %v31_v18 = vld [vmem:[%s812_s1 + $0x48] sm:$0xff]  ;;  %573 = vmatprep.subr.bf16.mxu1 %v633_v35  ;;  %v635_v36 = vmov 0.0   ;;  %vm425_vm3 = vcmask 58368  }
   0xf   :  { %v45_v19 = vld [vmem:[%s813_s2 + $0x38] sm:$0xff]  ;;  %v32_v20 = vld [vmem:[%s812_s1 + $0x50] sm:$0xff]  ;;  %v46_v21 = vld [vmem:[%s813_s2 + $0x40] sm:$0xff]  ;;  %570 = vmatprep.mubr.msk.f32.mxu1 %vm634_vm2, %v635_v36 }
  0x10   :  { %524 = vmatmul.mubr.msk.f32.gmra.mrb[6].mxu0 %vm134_vm1, %v29_v14  ;;  %v33_v22 = vld [vmem:[%s812_s1 + $0x58] sm:$0xff]  ;;  %v47_v23 = vld [vmem:[%s813_s2 + $0x48] sm:$0xff]  ;;  %v34_v24 = vld [vmem:[%s812_s1 + $0x60] sm:$0xff] }
  0x11   :  { %526 = vmatprep.mubr.msk.f32.mxu0 %vm134_vm1, %v30_v16  ;;  %86 = vperm.xlu0 %602, %v44_v17   ;;  %v48_v25 = vld [vmem:[%s813_s2 + $0x50] sm:$0xff]  ;;  %v35_v26 = vld [vmem:[%s812_s1 + $0x68] sm:$0xff]  ;;  %v49_v27 = vld [vmem:[%s813_s2 + $0x58] sm:$0xff] }
  0x12   :  { %91 = vperm.xlu1 %603, %v45_v19   ;;  %v36_v28 = vld [vmem:[%s812_s1 + $0x70] sm:$0xff]  ;;  %v50_v29 = vld [vmem:[%s813_s2 + $0x60] sm:$0xff]  ;;  %v37_v30 = vld [vmem:[%s812_s1 + $0x78] sm:$0xff] }
  0x13   :  { %v51_v31 = vld [vmem:[%s813_s2 + $0x68] sm:$0xff]  ;;  %v52_v32 = vld [vmem:[%s813_s2 + $0x70] sm:$0xff]  ;;  %v53_v33 = vld [vmem:[%s813_s2 + $0x78] sm:$0xff] }
  0x14   :  { %527 = vmatmul.mubr.msk.f32.gmra.mrb[8].mxu0 %vm134_vm1, %v31_v18  ;;  %v349_v34 = vld [vmem:[%s815_s4] sm:$0xff] }
  0x15   :  { %529 = vmatprep.mubr.msk.f32.mxu0 %vm134_vm1, %v32_v20  ;;  %96 = vperm.xlu0 %602, %v46_v21  }
  0x16   :  { %101 = vperm.xlu1 %603, %v47_v23  }
  0x18   :  { %530 = vmatmul.mubr.msk.f32.gmra.mrb[10].mxu0 %vm134_vm1, %v33_v22 }
  0x19   :  { %532 = vmatprep.mubr.msk.f32.mxu0 %vm134_vm1, %v34_v24  ;;  %106 = vperm.xlu0 %602, %v48_v25  }
  0x1a   :  { %111 = vperm.xlu1 %603, %v49_v27  }
  0x1c   :  { %533 = vmatmul.mubr.msk.f32.gmra.mrb[12].mxu0 %vm134_vm1, %v35_v26 }
  0x1d   :  { %535 = vmatprep.mubr.msk.f32.mxu0 %vm134_vm1, %v36_v28  ;;  %116 = vperm.xlu0 %602, %v50_v29  }
  0x1e   :  { %121 = vperm.xlu1 %603, %v51_v31  }
  0x20   :  { %536 = vmatmul.mubr.msk.f32.gmra.mrb[14].mxu0 %vm134_vm1, %v37_v30 }
  0x21   :  { %126 = vperm.xlu0 %602, %v52_v32  }
  0x22   :  { %131 = vperm.xlu1 %603, %v53_v33  }
  0x25   :  { %352 = vperm.xlu0 %602, %v349_v34  }
  0x83   :  { %v67_v37 = vpop.permute.xlu1 %66 }
  0x84   :  { %v57_v38 = vpop.permute.xlu0 %56 }
  0x87   :  { %v72_v39 = vpop.permute.xlu1 %71 }
  0x88   :  { %v62_v40 = vpop.permute.xlu0 %61 }
  0x8c   :  { %v77_v42 = vpop.permute.xlu0 %76 }
  0x8d   :  { %v82_v41 = vpop.permute.xlu1 %81 }
  0x90   :  { %v87_v51 = vpop.permute.xlu0 %86 }
  0x91   :  { %v92_v48 = vpop.permute.xlu1 %91 }
  0x94   :  { %v97_v0 = vpop.permute.xlu0 %96 }
  0x95   :  { %v102_v61 = vpop.permute.xlu1 %101 }
  0x98   :  { %v107_v12 = vpop.permute.xlu0 %106 }
  0x99   :  { %v112_v9 = vpop.permute.xlu1 %111 }
  0x9c   :  { %v117_v25 = vpop.permute.xlu0 %116 }
  0x9d   :  { %v122_v22 = vpop.permute.xlu1 %121 }
  0xa1   :  { %v132_v34 = vpop.permute.xlu1 %131 }
  0xd7   :  { %v516_v43 = vpop.f32.mrb[0].mxu0 }
  0xd8   :  { %v259_v44 = vadd.f32 %v516_v43, %v62_v40  ;;  %v253_v45 = vpop.f32.mrb[1].mxu0 }
  0xd9   :  { %v254_v46 = vadd.f32 %v253_v45, %v57_v38  ;;  %v127_v38 = vpop.permute.xlu0 %126 }
  0xda   :  { %v333_v47 = vmax.f32 %v259_v44, 0.0 }
  0xdb   :  { %v332_v49 = vmax.f32 %v254_v46, 0.0  ;;  %v519_v50 = vpop.f32.mrb[2].mxu0  ;;  %v348_v46 = vld [vmem:[%s814_s3] sm:$0xff]  ;;  %s636_s3 = smov [#allocation2]  }
  0xdc   :  { %v269_v52 = vadd.f32 %v519_v50, %v72_v39  ;;  %v263_v53 = vpop.f32.mrb[3].mxu0  ;;  %s453_s4 = sshll.u32 %s636_s3, 4  ;;  %s454_s4 = int_to_ptr.vmem [resolvable:$true] %s453_s4 }
  0xdd   :  { %v264_v54 = vadd.f32 %v263_v53, %v67_v37  ;;  %v574_v55 = vpack.c.bf16 %v333_v47, %v332_v49  ;;  %v353_v47 = vpop.permute.xlu0 %352  ;;  %s608_s8 = scalar_lea.vmem %s454_s4, 32  ;;  %p613_p1 = scmp.lt.s32.totalorder %s454_s4, %s454_s4 }
  0xde   :  { %v335_v56 = vmax.f32 %v269_v52, 0.0  ;;  %p609_p0 = scmp.ne.s32.totalorder %s454_s4, %s608_s8  ;;  %p614_p2 = scmp.lt.s32.totalorder %s608_s8, %s608_s8 }
  0xdf   :  { %v334_v57 = vmax.f32 %v264_v54, 0.0  ;;  %v522_v58 = vpop.f32.mrb[4].mxu0  ;;  %575 = vmatpush3.bf16.msra.mxu1 %v574_v55 }
  0xe0   :  { %v279_v59 = vadd.f32 %v522_v58, %v82_v41  ;;  %v273_v60 = vpop.f32.mrb[5].mxu0  ;;  %576 = vmatprep.subr.bf16.mxu1 %v633_v35  ;;  %p615_p3 = por %p614_p2, %p613_p1 }
  0xe1   :  { %v577_v62 = vpack.c.bf16 %v335_v56, %v334_v57  ;;  %v274_v63 = vadd.f32 %v273_v60, %v77_v42 }
  0xe2   :  { %v337_v1 = vmax.f32 %v279_v59, 0.0  ;;  %p616_p4 = pnand %p615_p3, %p609_p0 }
  0xe3   :  { %v336_v2 = vmax.f32 %v274_v63, 0.0  ;;  %v525_v3 = vpop.f32.mrb[6].mxu0  ;;  %578 = vmatpush3.bf16.msra.mxu1 %v577_v62 }
  0xe4   :  { %v289_v4 = vadd.f32 %v525_v3, %v92_v48  ;;  %v283_v5 = vpop.f32.mrb[7].mxu0  ;;  %579 = vmatprep.subr.bf16.mxu1 %v633_v35 }
  0xe5   :  { %v580_v6 = vpack.c.bf16 %v337_v1, %v336_v2  ;;  %v284_v7 = vadd.f32 %v283_v5, %v87_v51 }
  0xe6   :  { %v339_v8 = vmax.f32 %v289_v4, 0.0 }
  0xe7   :  { %v338_v10 = vmax.f32 %v284_v7, 0.0  ;;  %v528_v11 = vpop.f32.mrb[8].mxu0  ;;  %581 = vmatpush3.bf16.msra.mxu1 %v580_v6 }
  0xe8   :  { %v299_v13 = vadd.f32 %v528_v11, %v102_v61  ;;  %v293_v14 = vpop.f32.mrb[9].mxu0  ;;  %582 = vmatprep.subr.bf16.mxu1 %v633_v35 }
  0xe9   :  { %v583_v15 = vpack.c.bf16 %v339_v8, %v338_v10  ;;  %v294_v16 = vadd.f32 %v293_v14, %v97_v0 }
  0xea   :  { %v341_v17 = vmax.f32 %v299_v13, 0.0 }
  0xeb   :  { %v340_v18 = vmax.f32 %v294_v16, 0.0  ;;  %v531_v19 = vpop.f32.mrb[10].mxu0  ;;  %584 = vmatpush3.bf16.msra.mxu1 %v583_v15 }
  0xec   :  { %v309_v20 = vadd.f32 %v531_v19, %v112_v9  ;;  %v303_v21 = vpop.f32.mrb[11].mxu0  ;;  %585 = vmatprep.subr.bf16.mxu1 %v633_v35 }
  0xed   :  { %v586_v23 = vpack.c.bf16 %v341_v17, %v340_v18  ;;  %v304_v24 = vadd.f32 %v303_v21, %v107_v12 }
  0xee   :  { %v343_v26 = vmax.f32 %v309_v20, 0.0 }
  0xef   :  { %v342_v27 = vmax.f32 %v304_v24, 0.0  ;;  %v534_v28 = vpop.f32.mrb[12].mxu0  ;;  %587 = vmatpush3.bf16.msra.mxu1 %v586_v23 }
  0xf0   :  { %v319_v29 = vadd.f32 %v534_v28, %v122_v22  ;;  %v313_v30 = vpop.f32.mrb[13].mxu0  ;;  %588 = vmatprep.subr.bf16.mxu1 %v633_v35 }
  0xf1   :  { %v589_v31 = vpack.c.bf16 %v343_v26, %v342_v27  ;;  %v314_v32 = vadd.f32 %v313_v30, %v117_v25 }
  0xf2   :  { %v345_v33 = vmax.f32 %v319_v29, 0.0 }
  0xf3   :  { %v344_v36 = vmax.f32 %v314_v32, 0.0  ;;  %v537_v37 = vpop.f32.mrb[14].mxu0  ;;  %590 = vmatpush3.bf16.msra.mxu1 %v589_v31 }
  0xf4   :  { %v329_v39 = vadd.f32 %v537_v37, %v132_v34  ;;  %v323_v40 = vpop.f32.mrb[15].mxu0  ;;  %591 = vmatprep.subr.bf16.mxu1 %v633_v35 }
  0xf5   :  { %v592_v41 = vpack.c.bf16 %v345_v33, %v344_v36  ;;  %v324_v42 = vadd.f32 %v323_v40, %v127_v38 }
  0xf6   :  { %v347_v43 = vmax.f32 %v329_v39, 0.0 }
  0xf7   :  { %v346_v44 = vmax.f32 %v324_v42, 0.0  ;;  %593 = vmatpush3.bf16.msra.mxu1 %v592_v41 }
  0xf8   :  { %594 = vmatprep.subr.bf16.mxu1 %v633_v35 }
  0xf9   :  { %v595_v45 = vpack.c.bf16 %v347_v43, %v346_v44 }
  0xfb   :  { %596 = vmatpush3.bf16.msra.mxu1 %v595_v45 }
  0xfe   :  { %571 = vmatmul.mubr.f32.vlgmr.msra.gmra.mrb[0].mxu1 %v348_v46 }
 0x1d1   :  { %v421_v48 = vpop.f32.mrb[0].mxu1 }
 0x1d2   :  { %v422_v49 = vadd.f32 %v421_v48, %v353_v47  ;;  %v572_v50 = vpop.f32.mrb[1].mxu1 }
 0x1d4   :  { %v426_v51 = vsel %vm425_vm3, %v422_v49, -inf }
 0x1d5   :  { %v427_v52 = vrot.slane %v426_v51, 4 }
 0x1d7   :  { %v428_v53 = vmax.f32 %v426_v51, %v427_v52 }
 0x1d9   :  { %v429_v54 = vrot.slane %v428_v53, 2 }
 0x1db   :  { %v430_v55 = vmax.f32 %v428_v53, %v429_v54 }
 0x1dd   :  { %v431_v56 = vrot.slane %v430_v55, 1 }
 0x1df   :  { %v432_v35 = vmax.f32 %v430_v55, %v431_v56 }
 0x1e1   :  { %v433_v57 = vsub.f32 %v422_v49, %v432_v35 }
 0x1e3   :  { %v434_v58 = vmul.f32 1.442695, %v433_v57 }
 0x1e5   :  { %604 = vpow2.f32 %v434_v58 }
 0x1ef   :  { %v605_v59 = vpop.eup %604 }
 0x1f0   :  { %v436_v60 = vsel %vm425_vm3, %v605_v59, 0.0 }
 0x1f1   :  { %v437_v61 = vrot.slane %v436_v60, 4 }
 0x1f3   :  { %v438_v62 = vadd.f32 %v437_v61, %v436_v60 }
 0x1f5   :  { %v439_v63 = vrot.slane %v438_v62, 2 }
 0x1f7   :  { %v440_v0 = vadd.f32 %v439_v63, %v438_v62 }
 0x1f9   :  { %v441_v1 = vrot.slane %v440_v0, 1 }
 0x1fb   :  { %v442_v2 = vadd.f32 %v441_v1, %v440_v0 }
 0x1fd   :  { %606 = vrcp.f32 %v442_v2 }
 0x207   :  { %v607_v3 = vpop.eup %606 }
 0x208   :  { %v445_v4 = vmul.f32 %v607_v3, %v605_v59 }
 0x20a   :  { %446 = vst.msk [vmem:[#allocation2] sm:$0x3] %vm425_vm3, %v445_v4 }
 0x20b   :  { %619 = shalt.err (!%p616_p4)
}
 0x20c   :  { %s620_s11 = scalar_lea.hbm %s816_s5, 32 }
 0x20d   :  { %p621_p5 = scmp.ne.s32.totalorder %s816_s5, %s620_s11  ;;  %p624_p6 = scmp.lt.u32.totalorder %s620_s11, %s816_s5 }
 0x20f   :  { %p626_p7 = pnand %p624_p6, %p621_p5 }
 0x211   :  { %629 = shalt.err (!%p626_p7)
}
 0x212   :  { %456 = dma.vmem_to_hbm [thread:$0]  %s454_s4, 32, %s816_s5, [#allocation3]  }
 0x213   :  { %630 = dma.done.wait [#allocation3], 32  }
 0x214   :  { %631 = vsyncadd [#allocation3], 4294967264 }
 0x215   :  { %460 = vsyncpa [#allocation3], 1 }

</bundles_post_ra>
